<compile_context>
chip_gen: v7x
topology: tpu7x:2x2x1
jax: 0.10.0
libtpu: 0.0.40
codegen_flags: <defaults>
</compile_context>

<pallas_src>
import math

import jax
import jax.numpy as jnp
from jax.experimental import pallas as pl
from jax.experimental.pallas import tpu as pltpu


def _mm_att_kernel(topic_ref, image_ref, text_ref, w_ref, out_w_ref, out_b_ref, o_ref):
    topic = topic_ref[...]     # [S*B, H]  topic vector replicated per timestep
    img = image_ref[...]       # [S*B, H]
    txt = text_ref[...]        # [S*B, H]
    w = w_ref[...]             # [S*B, H]  att_w[s] replicated per batch row

    # Scalar attention scores (attention_dim == 1): one dot product per row.
    # Bias omitted: it is identical across the 3 modalities of a timestep and
    # cancels exactly in the softmax below.
    s_t = jnp.sum(topic * w, axis=-1, keepdims=True)   # [S*B, 1]
    s_i = jnp.sum(img * w, axis=-1, keepdims=True)     # [S*B, 1]
    s_x = jnp.sum(txt * w, axis=-1, keepdims=True)     # [S*B, 1]

    # Softmax over the 3 modalities fused with the bmm, which for
    # attention_dim == 1 reduces to a weighted sum of the three modality vectors.
    m = jnp.maximum(jnp.maximum(s_t, s_i), s_x)
    e_t = jnp.exp(s_t - m)
    e_i = jnp.exp(s_i - m)
    e_x = jnp.exp(s_x - m)
    # Full-precision reciprocal (approx=True EUP vrcp would risk the 1e-4 check).
    inv = pl.reciprocal(e_t + e_i + e_x, approx=False)
    mixed = (e_t * topic + e_i * img + e_x * txt) * inv   # [S*B, H]

    # out_linear for all timesteps at once: [S*B, H] @ [H, 2048] on the MXU,
    # lane-dense output (2048 = 16 * 128).
    out = jnp.dot(mixed, out_w_ref[...], preferred_element_type=jnp.float32)
    o_ref[...] = (out + out_b_ref[...]).astype(o_ref.dtype)


def multimodal_attention(topic, image, text, att_w, att_b, out_w, out_b):
    """topic: [1,B,H]; image/text: [S,B,H]; att_w: [S,H]; att_b: [S];
    out_w: [H,2048] (Linear weight transposed); out_b: [2048].
    Returns [S, B, 2048]."""
    S, B, H = image.shape
    NOUT = out_w.shape[1]
    SB = S * B
    del att_b  # cancels exactly in the softmax (same bias for all 3 modalities)

    # Flatten to [S*B, H]; row s*B + b holds timestep s, batch b.
    topic_flat = jnp.broadcast_to(topic.reshape(1, B, H), (S, B, H)).reshape(SB, H)
    image_flat = image.reshape(SB, H)
    text_flat = text.reshape(SB, H)
    w_flat = jnp.repeat(att_w, B, axis=0)        # [S*B, H]; row s*B+b == att_w[s]
    out_b2d = out_b.reshape(1, NOUT)

    # Whole problem is tiny (< 1 MiB): single invocation, everything resident in VMEM.
    vmem = pl.BlockSpec(memory_space=pltpu.MemorySpace.VMEM)
    out_flat = pl.pallas_call(
        _mm_att_kernel,
        out_shape=jax.ShapeDtypeStruct((SB, NOUT), jnp.float32),
        in_specs=[vmem] * 6,
        out_specs=vmem,
    )(topic_flat, image_flat, text_flat, w_flat, out_w, out_b2d)
    return out_flat.reshape(S, B, NOUT)


def reference(topic, image, text, att_w, att_b, out_w, out_b):
    """Pure-JAX mirror of the PyTorch forward (attention_dim == 1)."""
    S, B, H = image.shape
    topic2d = topic.reshape(B, H)
    outs = []
    for i in range(S):
        s_t = topic2d @ att_w[i] + att_b[i]        # [B]
        s_i = image[i] @ att_w[i] + att_b[i]       # [B]
        s_x = text[i] @ att_w[i] + att_b[i]        # [B]
        scores = jnp.stack([s_t, s_i, s_x], axis=-1)        # [B, 3]
        wgt = jax.nn.softmax(scores, axis=-1)
        mixed = (wgt[:, 0:1] * topic2d
                 + wgt[:, 1:2] * image[i]
                 + wgt[:, 2:3] * text[i])                   # [B, H]
        outs.append(mixed @ out_w + out_b)                  # [B, 2048]
    return jnp.stack(outs, axis=0)


if __name__ == "__main__":
    # model_cfgs: seq_len=4, topic.hidden_dim=32, MM_ATT.attention_dim=1
    S, B, H, NOUT = 4, 8, 32, 2048

    key = jax.random.PRNGKey(0)
    ks = jax.random.split(key, 7)
    topic = jax.random.normal(ks[0], (1, B, H), jnp.float32)
    image = jax.random.normal(ks[1], (S, B, H), jnp.float32)
    text = jax.random.normal(ks[2], (S, B, H), jnp.float32)

    # Deterministic parameter init (nn.Linear-style uniform bounds).
    bound = 1.0 / math.sqrt(H)
    att_w = jax.random.uniform(ks[3], (S, H), jnp.float32, -bound, bound)     # S x Linear(H,1).weight
    att_b = jax.random.uniform(ks[4], (S,), jnp.float32, -bound, bound)       # S x Linear(H,1).bias
    out_w = jax.random.uniform(ks[5], (H, NOUT), jnp.float32, -bound, bound)  # Linear(H,2048).weight.T
    out_b = jax.random.uniform(ks[6], (NOUT,), jnp.float32, -bound, bound)    # Linear(H,2048).bias

    out = multimodal_attention(topic, image, text, att_w, att_b, out_w, out_b)
    out = jax.block_until_ready(out)

    ref = reference(topic, image, text, att_w, att_b, out_w, out_b)
    assert out.shape == (S, B, NOUT)
    assert jnp.allclose(out, ref, atol=1e-4, rtol=1e-4), "mismatch vs reference"
    print("KERNEL_OK")
</pallas_src>

<mosaic_0001>
module attributes {stable_mosaic.version = 11 : i64} {
  func.func @_mm_att_kernel(%arg0: memref<32x32xf32, #tpu.memory_space<vmem>>, %arg1: memref<32x32xf32, #tpu.memory_space<vmem>>, %arg2: memref<32x32xf32, #tpu.memory_space<vmem>>, %arg3: memref<32x32xf32, #tpu.memory_space<vmem>>, %arg4: memref<32x2048xf32, #tpu.memory_space<vmem>>, %arg5: memref<1x2048xf32, #tpu.memory_space<vmem>>, %arg6: memref<32x2048xf32, #tpu.memory_space<vmem>>) attributes {dimension_semantics = [], scalar_prefetch = 0 : i64, scratch_operands = 0 : i64, tpu.core_type = #tpu.core_type<tc>} {
    %c0 = arith.constant 0 : index
    %c0_0 = arith.constant 0 : index
    %0 = vector.load %arg0[%c0, %c0_0] : memref<32x32xf32, #tpu.memory_space<vmem>>, vector<32x32xf32>
    %c0_1 = arith.constant 0 : index
    %c0_2 = arith.constant 0 : index
    %1 = vector.load %arg1[%c0_1, %c0_2] : memref<32x32xf32, #tpu.memory_space<vmem>>, vector<32x32xf32>
    %c0_3 = arith.constant 0 : index
    %c0_4 = arith.constant 0 : index
    %2 = vector.load %arg2[%c0_3, %c0_4] : memref<32x32xf32, #tpu.memory_space<vmem>>, vector<32x32xf32>
    %c0_5 = arith.constant 0 : index
    %c0_6 = arith.constant 0 : index
    %3 = vector.load %arg3[%c0_5, %c0_6] : memref<32x32xf32, #tpu.memory_space<vmem>>, vector<32x32xf32>
    %4 = arith.mulf %0, %3 : vector<32x32xf32>
    %cst = arith.constant dense<0.000000e+00> : vector<32xf32>
    %5 = vector.multi_reduction <add>, %4, %cst [1] : vector<32x32xf32> to vector<32xf32>
    %6 = vector.shape_cast %5 : vector<32xf32> to vector<32x1xf32>
    %7 = arith.mulf %1, %3 : vector<32x32xf32>
    %cst_7 = arith.constant dense<0.000000e+00> : vector<32xf32>
    %8 = vector.multi_reduction <add>, %7, %cst_7 [1] : vector<32x32xf32> to vector<32xf32>
    %9 = vector.shape_cast %8 : vector<32xf32> to vector<32x1xf32>
    %10 = arith.mulf %2, %3 : vector<32x32xf32>
    %cst_8 = arith.constant dense<0.000000e+00> : vector<32xf32>
    %11 = vector.multi_reduction <add>, %10, %cst_8 [1] : vector<32x32xf32> to vector<32xf32>
    %12 = vector.shape_cast %11 : vector<32xf32> to vector<32x1xf32>
    %13 = arith.maximumf %6, %9 : vector<32x1xf32>
    %14 = arith.maximumf %13, %12 : vector<32x1xf32>
    %15 = arith.subf %6, %14 : vector<32x1xf32>
    %16 = math.exp %15 : vector<32x1xf32>
    %17 = arith.subf %9, %14 : vector<32x1xf32>
    %18 = math.exp %17 : vector<32x1xf32>
    %19 = arith.subf %12, %14 : vector<32x1xf32>
    %20 = math.exp %19 : vector<32x1xf32>
    %21 = arith.addf %16, %18 : vector<32x1xf32>
    %22 = arith.addf %21, %20 : vector<32x1xf32>
    %23 = tpu.reciprocal %22 : vector<32x1xf32> -> vector<32x1xf32>
    %24 = vector.broadcast %16 : vector<32x1xf32> to vector<32x32xf32>
    %25 = arith.mulf %24, %0 : vector<32x32xf32>
    %26 = vector.broadcast %18 : vector<32x1xf32> to vector<32x32xf32>
    %27 = arith.mulf %26, %1 : vector<32x32xf32>
    %28 = arith.addf %25, %27 : vector<32x32xf32>
    %29 = vector.broadcast %20 : vector<32x1xf32> to vector<32x32xf32>
    %30 = arith.mulf %29, %2 : vector<32x32xf32>
    %31 = arith.addf %28, %30 : vector<32x32xf32>
    %32 = vector.broadcast %23 : vector<32x1xf32> to vector<32x32xf32>
    %33 = arith.mulf %31, %32 : vector<32x32xf32>
    %c0_9 = arith.constant 0 : index
    %c0_10 = arith.constant 0 : index
    %34 = vector.load %arg4[%c0_9, %c0_10] : memref<32x2048xf32, #tpu.memory_space<vmem>>, vector<32x2048xf32>
    %cst_11 = arith.constant dense<0.000000e+00> : vector<32x2048xf32>
    %35 = tpu.matmul %33, %34, %cst_11 {dimension_numbers = #tpu.dot_dimension_numbers<[1], [0], [0], [1], [0, 0, 1, 1], [], []>} : vector<32x32xf32>, vector<32x2048xf32>, vector<32x2048xf32> -> vector<32x2048xf32>
    %c0_12 = arith.constant 0 : index
    %c0_13 = arith.constant 0 : index
    %36 = vector.load %arg5[%c0_12, %c0_13] : memref<1x2048xf32, #tpu.memory_space<vmem>>, vector<1x2048xf32>
    %37 = vector.broadcast %36 : vector<1x2048xf32> to vector<32x2048xf32>
    %38 = arith.addf %35, %37 : vector<32x2048xf32>
    %c0_14 = arith.constant 0 : index
    %c0_15 = arith.constant 0 : index
    %39 = vector.load %arg6[%c0_14, %c0_15] : memref<32x2048xf32, #tpu.memory_space<vmem>>, vector<32x2048xf32>
    tpu.vector_store %arg6[%c0_14, %c0_15], %38 {strides = array<i32>} : memref<32x2048xf32, #tpu.memory_space<vmem>>, vector<32x2048xf32>,
    return
  }
}

</mosaic_0001>

<bundles_post_ra>
// kernel: tpu_custom_call.1
= control target key start
LH: loop header
LB: loop body
LE: loop exit
PB: predicated region body
PF: predicated region fallthrough
CT: control target
= control target key end

     0   :  { %11 = vsyncpa [#allocation3], 0  ;;  %s1841_s0 = inlined_call_operand.hbm [shape: f32[32,32], index: 0, kind: input, shape index: {}]   ;;  %s1842_s1 = inlined_call_operand.hbm [shape: f32[32,32], index: 1, kind: input, shape index: {}]   ;;  %s1843_s2 = inlined_call_operand.hbm [shape: f32[32,32], index: 2, kind: input, shape index: {}]   ;;  %s1844_s3 = inlined_call_operand.hbm [shape: f32[32,32], index: 3, kind: input, shape index: {}]   ;;  %s1845_s4 = inlined_call_operand.hbm [shape: f32[32,2048], index: 4, kind: input, shape index: {}]   ;;  %s1846_s5 = inlined_call_operand.vmem [shape: f32[1,2048], index: 5, kind: input, shape index: {}]   ;;  %s1847_s6 = inlined_call_operand.hbm [shape: f32[32,2048], index: 6, kind: output, shape index: {}]  }
   0x1   :  { %12 = vsyncpa [#allocation6], 0 }
   0x2   :  { %13 = vsyncpa [#allocation9], 0 }
   0x3   :  { %14 = vsyncpa [#allocation4], 0  ;;  %s1470_s21 = smov [#allocation5]   ;;  %s1471_s23 = smov [#allocation8]  }
   0x4   :  { %s32_s22 = sshll.u32 %s1470_s21, 4  ;;  %s56_s24 = sshll.u32 %s1471_s23, 4  ;;  %s33_s22 = int_to_ptr.vmem [resolvable:$true] %s32_s22  ;;  %s1515_s24 = int_to_ptr.vmem [resolvable:$true] %s56_s24 }
   0x5   :  { %s1330_s27 = scalar_lea.hbm %s1842_s1, 512 }
   0x6   :  { %p1331_p0 = scmp.ne.s32.totalorder %s1842_s1, %s1330_s27  ;;  %p1334_p1 = scmp.lt.u32.totalorder %s1330_s27, %s1842_s1 }
   0x8   :  { %p1336_p2 = pnand %p1334_p1, %p1331_p0 }
   0xa   :  { %1339 = shalt.err (!%p1336_p2)
}
   0xb   :  { %s1340_s8 = scalar_lea.vmem %s33_s22, 512  ;;  %p1345_p4 = scmp.lt.s32.totalorder %s33_s22, %s33_s22 }
   0xc   :  { %p1341_p3 = scmp.ne.s32.totalorder %s33_s22, %s1340_s8  ;;  %p1346_p5 = scmp.lt.s32.totalorder %s1340_s8, %s1340_s8 }
   0xe   :  { %p1347_p6 = por %p1346_p5, %p1345_p4 }
  0x10   :  { %p1348_p7 = pnand %p1347_p6, %p1341_p3 }
  0x12   :  { %1351 = shalt.err (!%p1348_p7)
}
  0x13   :  { %s1472_s9 = smov 128   ;;  %s1473_s10 = smov 8  }
  0x14   :  { %38 = dma.hbm_to_vmem [thread:$0]  %s1842_s1, 512, %s33_s22, [#allocation6], %s1472_s9, %s1472_s9, %s1473_s10  }
  0x15   :  { %s1352_s15 = scalar_lea.hbm %s1844_s3, 512 }
  0x16   :  { %p1353_p8 = scmp.ne.s32.totalorder %s1844_s3, %s1352_s15  ;;  %p1356_p9 = scmp.lt.u32.totalorder %s1352_s15, %s1844_s3 }
  0x18   :  { %p1358_p10 = pnand %p1356_p9, %p1353_p8 }
  0x1a   :  { %1361 = shalt.err (!%p1358_p10)
}
  0x1b   :  { %s1362_s20 = scalar_lea.vmem %s1515_s24, 512  ;;  %p1367_p12 = scmp.lt.s32.totalorder %s1515_s24, %s1515_s24 }
  0x1c   :  { %p1363_p11 = scmp.ne.s32.totalorder %s1515_s24, %s1362_s20  ;;  %p1368_p13 = scmp.lt.s32.totalorder %s1362_s20, %s1362_s20 }
  0x1e   :  { %p1369_p0 = por %p1368_p13, %p1367_p12 }
  0x20   :  { %p1370_p1 = pnand %p1369_p0, %p1363_p11 }
  0x22   :  { %1373 = shalt.err (!%p1370_p1)
}
  0x23   :  { %62 = dma.hbm_to_vmem [thread:$0]  %s1844_s3, 512, %s1515_s24, [#allocation9], %s1472_s9, %s1472_s9, %s1473_s10  }
  0x24   :  { %s1474_s22 = smov [#allocation2]   ;;  %s1475_s25 = smov [#allocation7]  }
  0x25   :  { %s20_s23 = sshll.u32 %s1474_s22, 4  ;;  %s44_s26 = sshll.u32 %s1475_s25, 4  ;;  %s21_s23 = int_to_ptr.vmem [resolvable:$true] %s20_s23  ;;  %s1552_s26 = int_to_ptr.vmem [resolvable:$true] %s44_s26 }
  0x26   :  { %s1374_s29 = scalar_lea.hbm %s1841_s0, 512 }
  0x27   :  { %p1375_p2 = scmp.ne.s32.totalorder %s1841_s0, %s1374_s29  ;;  %p1378_p3 = scmp.lt.u32.totalorder %s1374_s29, %s1841_s0 }
  0x29   :  { %p1380_p4 = pnand %p1378_p3, %p1375_p2 }
  0x2b   :  { %1383 = shalt.err (!%p1380_p4)
}
  0x2c   :  { %s1384_s3 = scalar_lea.vmem %s21_s23, 512  ;;  %p1389_p6 = scmp.lt.s32.totalorder %s21_s23, %s21_s23 }
  0x2d   :  { %p1385_p5 = scmp.ne.s32.totalorder %s21_s23, %s1384_s3  ;;  %p1390_p7 = scmp.lt.s32.totalorder %s1384_s3, %s1384_s3 }
  0x2f   :  { %p1391_p8 = por %p1390_p7, %p1389_p6 }
  0x31   :  { %p1392_p9 = pnand %p1391_p8, %p1385_p5 }
  0x33   :  { %1395 = shalt.err (!%p1392_p9)
}
  0x34   :  { %26 = dma.hbm_to_vmem [thread:$0]  %s1841_s0, 512, %s21_s23, [#allocation3], %s1472_s9, %s1472_s9, %s1473_s10  }
  0x35   :  { %s1396_s15 = scalar_lea.hbm %s1843_s2, 512 }
  0x36   :  { %p1397_p10 = scmp.ne.s32.totalorder %s1843_s2, %s1396_s15  ;;  %p1400_p11 = scmp.lt.u32.totalorder %s1396_s15, %s1843_s2 }
  0x38   :  { %p1402_p12 = pnand %p1400_p11, %p1397_p10 }
  0x3a   :  { %1405 = shalt.err (!%p1402_p12)
}
  0x3b   :  { %s1406_s20 = scalar_lea.vmem %s1552_s26, 512  ;;  %p1411_p0 = scmp.lt.s32.totalorder %s1552_s26, %s1552_s26 }
  0x3c   :  { %p1407_p13 = scmp.ne.s32.totalorder %s1552_s26, %s1406_s20  ;;  %p1412_p1 = scmp.lt.s32.totalorder %s1406_s20, %s1406_s20 }
  0x3e   :  { %p1413_p2 = por %p1412_p1, %p1411_p0 }
  0x40   :  { %p1414_p3 = pnand %p1413_p2, %p1407_p13 }
  0x42   :  { %1417 = shalt.err (!%p1414_p3)
}
  0x43   :  { %50 = dma.hbm_to_vmem [thread:$0]  %s1843_s2, 512, %s1552_s26, [#allocation6], %s1472_s9, %s1472_s9, %s1473_s10  }
  0x44   :  { %s1476_s21 = smov [#allocation10]   ;;  %s1418_s27 = scalar_lea.hbm %s1845_s4, 8192 }
  0x45   :  { %s68_s22 = sshll.u32 %s1476_s21, 4  ;;  %p1419_p4 = scmp.ne.s32.totalorder %s1845_s4, %s1418_s27  ;;  %s69_s22 = int_to_ptr.vmem [resolvable:$true] %s68_s22 }
  0x46   :  { %p1422_p5 = scmp.lt.u32.totalorder %s1418_s27, %s1845_s4 }
  0x48   :  { %p1424_p6 = pnand %p1422_p5, %p1419_p4 }
  0x4a   :  { %1427 = shalt.err (!%p1424_p6)
}
  0x4b   :  { %s1428_s8 = scalar_lea.vmem %s69_s22, 8192  ;;  %p1433_p8 = scmp.lt.s32.totalorder %s69_s22, %s69_s22 }
  0x4c   :  { %p1429_p7 = scmp.ne.s32.totalorder %s69_s22, %s1428_s8  ;;  %p1434_p9 = scmp.lt.s32.totalorder %s1428_s8, %s1428_s8 }
  0x4e   :  { %p1435_p10 = por %p1434_p9, %p1433_p8 }
  0x50   :  { %p1436_p11 = pnand %p1435_p10, %p1429_p7 }
  0x52   :  { %1439 = shalt.err (!%p1436_p11)
}
  0x53   :  { %s1477_s2 = smov 2048  }
  0x54   :  { %74 = dma.hbm_to_vmem [thread:$0]  %s1845_s4, 8192, %s69_s22, [#allocation9], %s1477_s2, %s1477_s2, %s1472_s9  }
  0x55   :  { %1462 = dma.done.wait [#allocation3], 512  }
  0x56   :  { %1463 = vsyncadd [#allocation3], 4294966784 }
  0x57   :  { %1464 = dma.done.wait [#allocation6], 1024  }
  0x58   :  { %1465 = vsyncadd [#allocation6], 4294966272 }
  0x59   :  { %1466 = dma.done.wait [#allocation9], 8704  }
  0x5a   :  { %1467 = vsyncadd [#allocation9], 4294958592  ;;  %v1604_v0 = vld [vmem:[#allocation7] sm:$0xff]  ;;  %vm112_vm0 = vcmask 261120   ;;  %v1610_v5 = vld [vmem:[#allocation2 + $0x8] sm:$0xff] }
  0x5b   :  { %v104_v1 = vld [vmem:[#allocation8] sm:$0xff]  ;;  %v105_v6 = vld [vmem:[#allocation8 + $0x8] sm:$0xff]  ;;  %v1626_v18 = vld [vmem:[#allocation5 + $0x10] sm:$0xff] }
  0x5c   :  { %v1606_v2 = vld [vmem:[#allocation2] sm:$0xff]  ;;  %v141_v3 = vmul.f32 %v104_v1, %v1604_v0  ;;  %v109_v8 = vmul.f32 %v105_v6, %v1610_v5  ;;  %v1616_v10 = vld [vmem:[#allocation7 + $0x8] sm:$0xff]  ;;  %v106_v19 = vld [vmem:[#allocation8 + $0x10] sm:$0xff] }
  0x5d   :  { %v108_v4 = vmul.f32 %v104_v1, %v1606_v2  ;;  %v1612_v7 = vld [vmem:[#allocation5] sm:$0xff]  ;;  %v1618_v11 = vld [vmem:[#allocation5 + $0x8] sm:$0xff]  ;;  %v142_v16 = vmul.f32 %v105_v6, %v1616_v10  ;;  %v1628_v20 = vld [vmem:[#allocation2 + $0x10] sm:$0xff]  ;;  %v127_v23 = vmul.f32 %v106_v19, %v1626_v18 }
  0x5e   :  { %v125_v9 = vmul.f32 %v104_v1, %v1612_v7  ;;  %v145_v12 = vsel %vm112_vm0, %v141_v3, 0.0  ;;  %v116_v14 = vsel %vm112_vm0, %v109_v8, 0.0  ;;  %v126_v17 = vmul.f32 %v105_v6, %v1618_v11  ;;  %v1634_v25 = vld [vmem:[#allocation7 + $0x10] sm:$0xff]  ;;  %v1636_v26 = vld [vmem:[#allocation2 + $0x18] sm:$0xff]  ;;  %v238_v40 = vld [vmem:[#allocation10 + $0x8] sm:$0xff] }
  0x5f   :  { %v113_v13 = vsel %vm112_vm0, %v108_v4, 0.0  ;;  %146 = vadd.xlane.f32.xlu1 %v145_v12  ;;  %v148_v21 = vsel %vm112_vm0, %v142_v16, 0.0  ;;  %v110_v24 = vmul.f32 %v106_v19, %v1628_v20  ;;  %v107_v27 = vld [vmem:[#allocation8 + $0x18] sm:$0xff]  ;;  %v135_v28 = vsel %vm112_vm0, %v127_v23, 0.0  ;;  %v254_v41 = vld [vmem:[#allocation10 + $0x88] sm:$0xff]  ;;  %v237_v45 = vld [vmem:[#allocation10] sm:$0xff] }
  0x60   :  { %114 = vadd.xlane.f32.xlu0 %v113_v13  ;;  %v129_v15 = vsel %vm112_vm0, %v125_v9, 0.0  ;;  %v132_v22 = vsel %vm112_vm0, %v126_v17, 0.0  ;;  %v143_v30 = vmul.f32 %v106_v19, %v1634_v25  ;;  %v111_v31 = vmul.f32 %v107_v27, %v1636_v26  ;;  %v1642_v32 = vld [vmem:[#allocation5 + $0x18] sm:$0xff]  ;;  %v253_v46 = vld [vmem:[#allocation10 + $0x80] sm:$0xff]  ;;  %v239_v49 = vld [vmem:[#allocation10 + $0x10] sm:$0xff] }
  0x61   :  { %v119_v29 = vsel %vm112_vm0, %v110_v24, 0.0  ;;  %v1644_v33 = vld [vmem:[#allocation7 + $0x18] sm:$0xff]  ;;  %v128_v36 = vmul.f32 %v107_v27, %v1642_v32  ;;  %v1224_v43 = vpack.c.bf16 %v254_v41, %v238_v40  ;;  %v1226_v48 = vpack.c.bf16 %v253_v46, %v237_v45  ;;  %v255_v50 = vld [vmem:[#allocation10 + $0x90] sm:$0xff]  ;;  %v270_v52 = vld [vmem:[#allocation10 + $0x108] sm:$0xff] }
  0x62   :  { %v151_v34 = vsel %vm112_vm0, %v143_v30, 0.0  ;;  %v122_v35 = vsel %vm112_vm0, %v111_v31, 0.0  ;;  %v144_v37 = vmul.f32 %v107_v27, %v1644_v33  ;;  %v240_v42 = vld [vmem:[#allocation10 + $0x18] sm:$0xff]  ;;  %v1234_v51 = vpack.c.bf16 %v255_v50, %v239_v49  ;;  %v286_v53 = vld [vmem:[#allocation10 + $0x188] sm:$0xff]  ;;  %v269_v57 = vld [vmem:[#allocation10 + $0x100] sm:$0xff] }
  0x63   :  { %117 = vadd.xlane.f32.xlu1 %v116_v14  ;;  %v138_v38 = vsel %vm112_vm0, %v128_v36, 0.0  ;;  %v256_v44 = vld [vmem:[#allocation10 + $0x98] sm:$0xff]  ;;  %1225 = vmatprep.subr.bf16.mxu0 %v1224_v43  ;;  %v1228_v55 = vpack.c.bf16 %v286_v53, %v270_v52  ;;  %v285_v58 = vld [vmem:[#allocation10 + $0x180] sm:$0xff]  ;;  %v271_v61 = vld [vmem:[#allocation10 + $0x110] sm:$0xff]  ;;  %v1478_v1 = vmov 0.0  }
  0x64   :  { %130 = vadd.xlane.f32.xlu0 %v129_v15  ;;  %v154_v39 = vsel %vm112_vm0, %v144_v37, 0.0  ;;  %v1232_v47 = vpack.c.bf16 %v256_v44, %v240_v42  ;;  %1227 = vmatpush1.bf16.msra.mxu0 %v1226_v48  ;;  %v272_v54 = vld [vmem:[#allocation10 + $0x118] sm:$0xff]  ;;  %v1230_v60 = vpack.c.bf16 %v285_v58, %v269_v57  ;;  %v287_v62 = vld [vmem:[#allocation10 + $0x190] sm:$0xff]  ;;  %v242_v3 = vld [vmem:[#allocation10 + $0x28] sm:$0xff] }
  0x65   :  { %v288_v56 = vld [vmem:[#allocation10 + $0x198] sm:$0xff]  ;;  %1229 = vmatprep.subr.bf16.mxu0 %v1228_v55  ;;  %v1238_v63 = vpack.c.bf16 %v287_v62, %v271_v61  ;;  %461 = vmatprep.mubr.f32.mxu0 %v1478_v1  ;;  %v258_v4 = vld [vmem:[#allocation10 + $0xa8] sm:$0xff] }
  0x66   :  { %1233 = vmatprep.subr.bf16.mxu1 %v1232_v47  ;;  %v1236_v59 = vpack.c.bf16 %v288_v56, %v272_v54  ;;  %550 = vmatprep.mubr.f32.mxu1 %v1478_v1  ;;  %v244_v6 = vld [vmem:[#allocation10 + $0x38] sm:$0xff]  ;;  %v1240_v8 = vpack.c.bf16 %v258_v4, %v242_v3 }
  0x67   :  { %149 = vadd.xlane.f32.xlu1 %v148_v21  ;;  %1235 = vmatpush1.bf16.msra.mxu1 %v1234_v51  ;;  %v260_v9 = vld [vmem:[#allocation10 + $0xb8] sm:$0xff] }
  0x68   :  { %133 = vadd.xlane.f32.xlu0 %v132_v22  ;;  %1237 = vmatprep.subr.bf16.mxu1 %v1236_v59  ;;  %v1248_v12 = vpack.c.bf16 %v260_v9, %v244_v6 }
  0x69   :  { %1231 = vmatpush1.bf16.msra.mxu0 %v1230_v60 }
  0x6a   :  { %1241 = vmatprep.subr.bf16.mxu0 %v1240_v8 }
  0x6b   :  { %136 = vadd.xlane.f32.xlu1 %v135_v28  ;;  %1239 = vmatpush1.bf16.msra.mxu1 %v1238_v63 }
  0x6c   :  { %120 = vadd.xlane.f32.xlu0 %v119_v29  ;;  %1249 = vmatprep.subr.bf16.mxu1 %v1248_v12 }
  0x6f   :  { %123 = vadd.xlane.f32.xlu1 %v122_v35 }
  0x70   :  { %152 = vadd.xlane.f32.xlu0 %v151_v34 }
  0x73   :  { %155 = vadd.xlane.f32.xlu1 %v154_v39 }
  0x74   :  { %139 = vadd.xlane.f32.xlu0 %v138_v38 }
  0xec   :  { %v147_v13 = vpop.xlane.xlu1 %146 }
  0xed   :  { %v115_v14 = vpop.xlane.xlu0 %114 }
  0xf0   :  { %v118_v15 = vpop.xlane.xlu1 %117 }
  0xf1   :  { %v131_v16 = vpop.xlane.xlu0 %130 }
  0xf2   :  { %v157_v17 = vmax.f32 %v115_v14, %v131_v16 }
  0xf4   :  { %v161_v19 = vmax.f32 %v157_v17, %v147_v13  ;;  %v150_v21 = vpop.xlane.xlu1 %149 }
  0xf5   :  { %v134_v22 = vpop.xlane.xlu0 %133 }
  0xf6   :  { %v165_v23 = vsub.f32 %v115_v14, %v161_v19  ;;  %v177_v24 = vsub.f32 %v131_v16, %v161_v19  ;;  %v189_v27 = vsub.f32 %v147_v13, %v161_v19  ;;  %v158_v28 = vmax.f32 %v118_v15, %v134_v22 }
  0xf8   :  { %v169_v29 = vmul.f32 1.442695, %v165_v23  ;;  %v181_v30 = vmul.f32 1.442695, %v177_v24  ;;  %v162_v31 = vmax.f32 %v158_v28, %v150_v21  ;;  %v193_v34 = vmul.f32 1.442695, %v189_v27  ;;  %v137_v35 = vpop.xlane.xlu1 %136 }
  0xf9   :  { %v121_v36 = vpop.xlane.xlu0 %120  ;;  %v241_v28 = vld [vmem:[#allocation10 + $0x20] sm:$0xff] }
  0xfa   :  { %1298 = vpow2.f32 %v169_v29  ;;  %v166_v37 = vsub.f32 %v118_v15, %v162_v31  ;;  %v178_v38 = vsub.f32 %v134_v22, %v162_v31  ;;  %v190_v39 = vsub.f32 %v150_v21, %v162_v31  ;;  %v243_v31 = vld [vmem:[#allocation10 + $0x30] sm:$0xff] }
  0xfb   :  { %1300 = vpow2.f32 %v181_v30  ;;  %v159_v42 = vmax.f32 %v121_v36, %v137_v35 }
  0xfc   :  { %v171_v40 = vmul.f32 1.442695, %v166_v37  ;;  %v183_v41 = vmul.f32 1.442695, %v178_v38  ;;  %1302 = vpow2.f32 %v193_v34  ;;  %v195_v43 = vmul.f32 1.442695, %v190_v39  ;;  %v124_v45 = vpop.xlane.xlu1 %123 }
  0xfd   :  { %v153_v44 = vpop.xlane.xlu0 %152  ;;  %v290_v38 = vld [vmem:[#allocation10 + $0x1a8] sm:$0xff]  ;;  %v276_v39 = vld [vmem:[#allocation10 + $0x138] sm:$0xff] }
  0xfe   :  { %1304 = vpow2.f32 %v171_v40  ;;  %v163_v46 = vmax.f32 %v159_v42, %v153_v44  ;;  %v292_v40 = vld [vmem:[#allocation10 + $0x1b8] sm:$0xff] }
  0xff   :  { %1306 = vpow2.f32 %v183_v41 }
 0x100   :  { %v167_v47 = vsub.f32 %v121_v36, %v163_v46  ;;  %v179_v48 = vsub.f32 %v137_v35, %v163_v46  ;;  %v191_v49 = vsub.f32 %v153_v44, %v163_v46  ;;  %1308 = vpow2.f32 %v195_v43  ;;  %v156_v51 = vpop.xlane.xlu1 %155  ;;  %v274_v35 = vld [vmem:[#allocation10 + $0x128] sm:$0xff] }
 0x101   :  { %v140_v50 = vpop.xlane.xlu0 %139 }
 0x102   :  { %v173_v52 = vmul.f32 1.442695, %v167_v47  ;;  %v185_v53 = vmul.f32 1.442695, %v179_v48  ;;  %v160_v54 = vmax.f32 %v124_v45, %v140_v50  ;;  %v197_v55 = vmul.f32 1.442695, %v191_v49 }
 0x103   :  { %v289_v47 = vld [vmem:[#allocation10 + $0x1a0] sm:$0xff]  ;;  %v275_v48 = vld [vmem:[#allocation10 + $0x130] sm:$0xff] }
 0x104   :  { %v1299_v56 = vpop.eup %1298  ;;  %1310 = vpow2.f32 %v173_v52  ;;  %v164_v57 = vmax.f32 %v160_v54, %v156_v51  ;;  %v291_v49 = vld [vmem:[#allocation10 + $0x1b0] sm:$0xff]  ;;  %v1252_v52 = vpack.c.bf16 %v292_v40, %v276_v39 }
 0x105   :  { %v1301_v58 = vpop.eup %1300  ;;  %1312 = vpow2.f32 %v185_v53  ;;  %v213_v15 = vmul.f32 %v1299_v56, %v1606_v2  ;;  %v257_v2 = vld [vmem:[#allocation10 + $0xa0] sm:$0xff]  ;;  %v246_v53 = vld [vmem:[#allocation10 + $0x48] sm:$0xff] }
 0x106   :  { %v201_v59 = vadd.f32 %v1301_v58, %v1299_v56  ;;  %v168_v60 = vsub.f32 %v124_v45, %v164_v57  ;;  %v1303_v61 = vpop.eup %1302  ;;  %1314 = vpow2.f32 %v197_v55  ;;  %v180_v62 = vsub.f32 %v140_v50, %v164_v57 }
 0x107   :  { %v192_v63 = vsub.f32 %v156_v51, %v164_v57  ;;  %v217_v16 = vmul.f32 %v1301_v58, %v1612_v7  ;;  %v225_v30 = vmul.f32 %v1303_v61, %v1604_v0  ;;  %v259_v7 = vld [vmem:[#allocation10 + $0xb0] sm:$0xff]  ;;  %v1244_v51 = vpack.c.bf16 %v290_v38, %v274_v35  ;;  %v264_v57 = vld [vmem:[#allocation10 + $0xd8] sm:$0xff]  ;;  %v250_v35 = vld [vmem:[#allocation10 + $0x68] sm:$0xff] }
 0x108   :  { %v1305_v3 = vpop.eup %1304  ;;  %v205_v4 = vadd.f32 %v1303_v61, %v201_v59  ;;  %v175_v6 = vmul.f32 1.442695, %v168_v60  ;;  %v187_v9 = vmul.f32 1.442695, %v180_v62  ;;  %v1250_v42 = vpack.c.bf16 %v259_v7, %v243_v31  ;;  %v279_v7 = vld [vmem:[#allocation10 + $0x150] sm:$0xff]  ;;  %v268_v38 = vld [vmem:[#allocation10 + $0xf8] sm:$0xff] }
 0x109   :  { %v1307_v8 = vpop.eup %1306  ;;  %v199_v12 = vmul.f32 1.442695, %v192_v63  ;;  %v221_v22 = vadd.f32 %v217_v16, %v213_v15  ;;  %v214_v23 = vmul.f32 %v1305_v3, %v1610_v5  ;;  %v1242_v5 = vpack.c.bf16 %v257_v2, %v241_v28  ;;  %v245_v15 = vld [vmem:[#allocation10 + $0x40] sm:$0xff] }
 0x10a   :  { %1316 = vrcp.f32 %v205_v4  ;;  %v202_v13 = vadd.f32 %v1307_v8, %v1305_v3  ;;  %v1309_v14 = vpop.eup %1308  ;;  %v218_v24 = vmul.f32 %v1307_v8, %v1618_v11  ;;  %v273_v11 = vld [vmem:[#allocation10 + $0x120] sm:$0xff]  ;;  %v1254_v59 = vpack.c.bf16 %v291_v49, %v275_v48  ;;  %v300_v48 = vld [vmem:[#allocation10 + $0x1f8] sm:$0xff] }
 0x10b   :  { %1318 = vpow2.f32 %v175_v6  ;;  %v229_v36 = vadd.f32 %v225_v30, %v221_v22  ;;  %v226_v0 = vmul.f32 %v1309_v14, %v1616_v10  ;;  %v262_v10 = vld [vmem:[#allocation10 + $0xc8] sm:$0xff]  ;;  %v1246_v58 = vpack.c.bf16 %v289_v47, %v273_v11  ;;  %v293_v30 = vld [vmem:[#allocation10 + $0x1c0] sm:$0xff]  ;;  %v284_v47 = vld [vmem:[#allocation10 + $0x178] sm:$0xff] }
 0x10c   :  { %v206_v17 = vadd.f32 %v1309_v14, %v202_v13  ;;  %1320 = vpow2.f32 %v187_v9  ;;  %v222_v37 = vadd.f32 %v218_v24, %v214_v23  ;;  %v1256_v63 = vpack.c.bf16 %v262_v10, %v246_v53  ;;  %v278_v22 = vld [vmem:[#allocation10 + $0x148] sm:$0xff]  ;;  %v280_v23 = vld [vmem:[#allocation10 + $0x158] sm:$0xff]  ;;  %v265_v11 = vld [vmem:[#allocation10 + $0xe0] sm:$0xff] }
 0x10d   :  { %1322 = vpow2.f32 %v199_v12  ;;  %v296_v24 = vld [vmem:[#allocation10 + $0x1d8] sm:$0xff]  ;;  %v1284_v53 = vpack.c.bf16 %v300_v48, %v284_v47 }
 0x10e   :  { %v1311_v19 = vpop.eup %1310  ;;  %1324 = vrcp.f32 %v206_v17  ;;  %v230_v55 = vadd.f32 %v226_v0, %v222_v37  ;;  %v261_v17 = vld [vmem:[#allocation10 + $0xc0] sm:$0xff]  ;;  %v1268_v31 = vpack.c.bf16 %v296_v24, %v280_v23  ;;  %v252_v37 = vld [vmem:[#allocation10 + $0x78] sm:$0xff]  ;;  %v267_v0 = vld [vmem:[#allocation10 + $0xf0] sm:$0xff] }
 0x10f   :  { %v1313_v21 = vpop.eup %1312  ;;  %v215_v45 = vmul.f32 %v1311_v19, %v1628_v20  ;;  %v248_v20 = vld [vmem:[#allocation10 + $0x58] sm:$0xff] }
 0x110   :  { %v203_v27 = vadd.f32 %v1313_v21, %v1311_v19  ;;  %v1315_v29 = vpop.eup %1314  ;;  %v219_v46 = vmul.f32 %v1313_v21, %v1626_v18  ;;  %v1264_v3 = vpack.c.bf16 %v264_v57, %v248_v20  ;;  %v247_v19 = vld [vmem:[#allocation10 + $0x50] sm:$0xff] }
 0x111   :  { %v227_v4 = vmul.f32 %v1315_v29, %v1634_v25  ;;  %v263_v21 = vld [vmem:[#allocation10 + $0xd0] sm:$0xff] }
 0x112   :  { %v207_v34 = vadd.f32 %v1315_v29, %v203_v27  ;;  %v223_v61 = vadd.f32 %v219_v46, %v215_v45  ;;  %v1258_v27 = vpack.c.bf16 %v261_v17, %v245_v15  ;;  %v1266_v28 = vpack.c.bf16 %v263_v21, %v247_v19  ;;  %v277_v29 = vld [vmem:[#allocation10 + $0x140] sm:$0xff]  ;;  %v282_v45 = vld [vmem:[#allocation10 + $0x168] sm:$0xff] }
 0x113   :  { %v1262_v39 = vpack.c.bf16 %v293_v30, %v277_v29  ;;  %v298_v46 = vld [vmem:[#allocation10 + $0x1e8] sm:$0xff] }
 0x114   :  { %v1317_v41 = vpop.eup %1316  ;;  %1326 = vrcp.f32 %v207_v34  ;;  %v231_v9 = vadd.f32 %v227_v4, %v223_v61  ;;  %v295_v34 = vld [vmem:[#allocation10 + $0x1d0] sm:$0xff] }
 0x115   :  { %v1319_v43 = vpop.eup %1318  ;;  %v1659_v44 = vmul.f32 %v1317_v41, %v229_v36  ;;  %v266_v36 = vld [vmem:[#allocation10 + $0xe8] sm:$0xff]  ;;  %v1270_v40 = vpack.c.bf16 %v295_v34, %v279_v7 }
 0x116   :  { %v1321_v50 = vpop.eup %1320  ;;  %v216_v6 = vmul.f32 %v1319_v43, %v1636_v26  ;;  %v1272_v41 = vpack.c.bf16 %v266_v36, %v250_v35 }
 0x117   :  { %v1323_v54 = vpop.eup %1322  ;;  %v204_v56 = vadd.f32 %v1321_v50, %v1319_v43  ;;  %1192 = vmatmul.mubr.msk.f32.vlgmr.msra.gmra.mrb[0].mxu0 %vm112_vm0, %v1659_v44  ;;  %1196 = vmatmul.mubr.msk.f32.vlgmr.msra.gmra.mrb[0].mxu1 %vm112_vm0, %v1659_v44  ;;  %v220_v8 = vmul.f32 %v1321_v50, %v1642_v32  ;;  %v251_v43 = vld [vmem:[#allocation10 + $0x70] sm:$0xff] }
 0x118   :  { %v1325_v18 = vpop.eup %1324  ;;  %467 = vmatprep.mubr.f32.mxu0 %v1478_v1  ;;  %556 = vmatprep.mubr.f32.mxu1 %v1478_v1  ;;  %v228_v26 = vmul.f32 %v1323_v54, %v1644_v33  ;;  %v294_v33 = vld [vmem:[#allocation10 + $0x1c8] sm:$0xff]  ;;  %v1282_v50 = vpack.c.bf16 %v267_v0, %v251_v43 }
 0x119   :  { %v1670_v60 = vmul.f32 %v1325_v18, %v230_v55  ;;  %v208_v62 = vadd.f32 %v1323_v54, %v204_v56  ;;  %1243 = vmatpush1.bf16.msra.mxu0 %v1242_v5  ;;  %1251 = vmatpush1.bf16.msra.mxu1 %v1250_v42  ;;  %v224_v13 = vadd.f32 %v220_v8, %v216_v6  ;;  %v249_v42 = vld [vmem:[#allocation10 + $0x60] sm:$0xff]  ;;  %v283_v55 = vld [vmem:[#allocation10 + $0x170] sm:$0xff] }
 0x11a   :  { %1245 = vmatprep.subr.bf16.mxu0 %v1244_v51  ;;  %1253 = vmatprep.subr.bf16.mxu1 %v1252_v52  ;;  %v1260_v2 = vpack.c.bf16 %v294_v33, %v278_v22  ;;  %v1280_v5 = vpack.c.bf16 %v268_v38, %v252_v37  ;;  %v1274_v49 = vpack.c.bf16 %v265_v11, %v249_v42  ;;  %v281_v51 = vld [vmem:[#allocation10 + $0x160] sm:$0xff]  ;;  %v299_v56 = vld [vmem:[#allocation10 + $0x1f0] sm:$0xff] }
 0x11b   :  { %1328 = vrcp.f32 %v208_v62  ;;  %1193 = vmatmul.mubr.msk.f32.gmra.mrb[2].mxu0 %vm112_vm0, %v1670_v60  ;;  %1197 = vmatmul.mubr.msk.f32.gmra.mrb[2].mxu1 %vm112_vm0, %v1670_v60  ;;  %v232_v32 = vadd.f32 %v228_v26, %v224_v13  ;;  %v1276_v52 = vpack.c.bf16 %v298_v46, %v282_v45  ;;  %v297_v54 = vld [vmem:[#allocation10 + $0x1e0] sm:$0xff]  ;;  %v1286_v20 = vpack.c.bf16 %v299_v56, %v283_v55 }
 0x11c   :  { %473 = vmatprep.mubr.f32.mxu0 %v1478_v1  ;;  %562 = vmatprep.mubr.f32.mxu1 %v1478_v1  ;;  %v1278_v10 = vpack.c.bf16 %v297_v54, %v281_v51 }
 0x11d   :  { %1247 = vmatpush1.bf16.msra.mxu0 %v1246_v58  ;;  %1255 = vmatpush1.bf16.msra.mxu1 %v1254_v59  ;;  %v301_v59 = vld [vmem:[%s1846_s5] sm:$0xff] }
 0x11e   :  { %v1327_v12 = vpop.eup %1326  ;;  %1257 = vmatprep.subr.bf16.mxu0 %v1256_v63  ;;  %1265 = vmatprep.subr.bf16.mxu1 %v1264_v3 }
 0x11f   :  { %v1681_v25 = vmul.f32 %v1327_v12, %v231_v9 }
 0x121   :  { %1194 = vmatmul.mubr.msk.f32.gmra.mrb[4].mxu0 %vm112_vm0, %v1681_v25  ;;  %1198 = vmatmul.mubr.msk.f32.gmra.mrb[4].mxu1 %vm112_vm0, %v1681_v25 }
 0x122   :  { %479 = vmatprep.mubr.f32.mxu0 %v1478_v1  ;;  %568 = vmatprep.mubr.f32.mxu1 %v1478_v1 }
 0x125   :  { %v1329_v14 = vpop.eup %1328 }
 0x126   :  { %v1690_v16 = vmul.f32 %v1329_v14, %v232_v32 }
 0x128   :  { %1195 = vmatmul.mubr.msk.f32.gmra.mrb[6].mxu0 %vm112_vm0, %v1690_v16  ;;  %1199 = vmatmul.mubr.msk.f32.gmra.mrb[6].mxu1 %vm112_vm0, %v1690_v16 }
 0x129   :  { %639 = vmatprep.mubr.f32.mxu0 %v1478_v1  ;;  %728 = vmatprep.mubr.f32.mxu1 %v1478_v1 }
 0x12c   :  { %1200 = vmatmul.mubr.msk.f32.vlgmr.msra.gmra.mrb[8].mxu0 %vm112_vm0, %v1659_v44  ;;  %1204 = vmatmul.mubr.msk.f32.vlgmr.msra.gmra.mrb[8].mxu1 %vm112_vm0, %v1659_v44 }
 0x12d   :  { %1259 = vmatpush1.bf16.msra.mxu0 %v1258_v27  ;;  %1267 = vmatpush1.bf16.msra.mxu1 %v1266_v28 }
 0x12e   :  { %645 = vmatprep.mubr.f32.mxu0 %v1478_v1  ;;  %734 = vmatprep.mubr.f32.mxu1 %v1478_v1 }
 0x12f   :  { %1261 = vmatprep.subr.bf16.mxu0 %v1260_v2  ;;  %1269 = vmatprep.subr.bf16.mxu1 %v1268_v31 }
 0x130   :  { %1201 = vmatmul.mubr.msk.f32.gmra.mrb[10].mxu0 %vm112_vm0, %v1670_v60  ;;  %1205 = vmatmul.mubr.msk.f32.gmra.mrb[10].mxu1 %vm112_vm0, %v1670_v60 }
 0x131   :  { %651 = vmatprep.mubr.f32.mxu0 %v1478_v1  ;;  %740 = vmatprep.mubr.f32.mxu1 %v1478_v1 }
 0x132   :  { %1263 = vmatpush1.bf16.msra.mxu0 %v1262_v39  ;;  %1271 = vmatpush1.bf16.msra.mxu1 %v1270_v40 }
 0x133   :  { %1273 = vmatprep.subr.bf16.mxu0 %v1272_v41  ;;  %1281 = vmatprep.subr.bf16.mxu1 %v1280_v5 }
 0x134   :  { %1202 = vmatmul.mubr.msk.f32.gmra.mrb[12].mxu0 %vm112_vm0, %v1681_v25  ;;  %1206 = vmatmul.mubr.msk.f32.gmra.mrb[12].mxu1 %vm112_vm0, %v1681_v25 }
 0x135   :  { %657 = vmatprep.mubr.f32.mxu0 %v1478_v1  ;;  %746 = vmatprep.mubr.f32.mxu1 %v1478_v1 }
 0x138   :  { %1203 = vmatmul.mubr.msk.f32.gmra.mrb[14].mxu0 %vm112_vm0, %v1690_v16  ;;  %1207 = vmatmul.mubr.msk.f32.gmra.mrb[14].mxu1 %vm112_vm0, %v1690_v16 }
 0x139   :  { %817 = vmatprep.mubr.f32.mxu0 %v1478_v1  ;;  %906 = vmatprep.mubr.f32.mxu1 %v1478_v1 }
 0x13c   :  { %1208 = vmatmul.mubr.msk.f32.vlgmr.msra.gmra.mrb[16].mxu0 %vm112_vm0, %v1659_v44  ;;  %1212 = vmatmul.mubr.msk.f32.vlgmr.msra.gmra.mrb[16].mxu1 %vm112_vm0, %v1659_v44 }
 0x13d   :  { %1275 = vmatpush1.bf16.msra.mxu0 %v1274_v49  ;;  %1283 = vmatpush1.bf16.msra.mxu1 %v1282_v50 }
 0x13e   :  { %823 = vmatprep.mubr.f32.mxu0 %v1478_v1  ;;  %912 = vmatprep.mubr.f32.mxu1 %v1478_v1 }
 0x13f   :  { %1277 = vmatprep.subr.bf16.mxu0 %v1276_v52  ;;  %1285 = vmatprep.subr.bf16.mxu1 %v1284_v53 }
 0x140   :  { %1209 = vmatmul.mubr.msk.f32.gmra.mrb[18].mxu0 %vm112_vm0, %v1670_v60  ;;  %1213 = vmatmul.mubr.msk.f32.gmra.mrb[18].mxu1 %vm112_vm0, %v1670_v60 }
 0x141   :  { %829 = vmatprep.mubr.f32.mxu0 %v1478_v1  ;;  %918 = vmatprep.mubr.f32.mxu1 %v1478_v1 }
 0x142   :  { %1279 = vmatpush1.bf16.msra.mxu0 %v1278_v10  ;;  %1287 = vmatpush1.bf16.msra.mxu1 %v1286_v20 }
 0x144   :  { %1210 = vmatmul.mubr.msk.f32.gmra.mrb[20].mxu0 %vm112_vm0, %v1681_v25  ;;  %1214 = vmatmul.mubr.msk.f32.gmra.mrb[20].mxu1 %vm112_vm0, %v1681_v25 }
 0x145   :  { %835 = vmatprep.mubr.f32.mxu0 %v1478_v1  ;;  %924 = vmatprep.mubr.f32.mxu1 %v1478_v1 }
 0x148   :  { %1211 = vmatmul.mubr.msk.f32.gmra.mrb[22].mxu0 %vm112_vm0, %v1690_v16  ;;  %1215 = vmatmul.mubr.msk.f32.gmra.mrb[22].mxu1 %vm112_vm0, %v1690_v16 }
 0x149   :  { %995 = vmatprep.mubr.f32.mxu0 %v1478_v1  ;;  %1084 = vmatprep.mubr.f32.mxu1 %v1478_v1 }
 0x14c   :  { %1216 = vmatmul.mubr.msk.f32.vlgmr.msra.gmra.mrb[24].mxu0 %vm112_vm0, %v1659_v44  ;;  %1220 = vmatmul.mubr.msk.f32.vlgmr.msra.gmra.mrb[24].mxu1 %vm112_vm0, %v1659_v44  ;;  %v305_v44 = vlaneseq }
 0x14d   :  { %1001 = vmatprep.mubr.f32.mxu0 %v1478_v1  ;;  %1090 = vmatprep.mubr.f32.mxu1 %v1478_v1 }
 0x14e   :  { %v1768_v57 = vshrl.u32 %v305_v44, 7 }
 0x150   :  { %1217 = vmatmul.mubr.msk.f32.gmra.mrb[26].mxu0 %vm112_vm0, %v1670_v60  ;;  %1221 = vmatmul.mubr.msk.f32.gmra.mrb[26].mxu1 %vm112_vm0, %v1670_v60  ;;  %v307_v18 = vsub.s32 0, %v1768_v57  ;;  %v315_v58 = vsub.s32 2, %v1768_v57  ;;  %v311_v60 = vsub.s32 1, %v1768_v57  ;;  %v323_v31 = vsub.s32 4, %v1768_v57 }
 0x151   :  { %1007 = vmatprep.mubr.f32.mxu0 %v1478_v1  ;;  %1096 = vmatprep.mubr.f32.mxu1 %v1478_v1  ;;  %v331_v7 = vsub.s32 6, %v1768_v57  ;;  %v327_v34 = vsub.s32 5, %v1768_v57  ;;  %v335_v35 = vsub.s32 7, %v1768_v57 }
 0x152   :  { %v308_v61 = vrot.slane %v301_v59, %v307_v18  ;;  %v316_v62 = vrot.slane %v301_v59, %v315_v58  ;;  %v312_v63 = vrot.slane %v301_v59, %v311_v60  ;;  %v324_v5 = vrot.slane %v301_v59, %v323_v31 }
 0x153   :  { %v332_v42 = vrot.slane %v301_v59, %v331_v7  ;;  %v328_v0 = vrot.slane %v301_v59, %v327_v34  ;;  %v336_v45 = vrot.slane %v301_v59, %v335_v35 }
 0x154   :  { %1218 = vmatmul.mubr.msk.f32.gmra.mrb[28].mxu0 %vm112_vm0, %v1681_v25  ;;  %1222 = vmatmul.mubr.msk.f32.gmra.mrb[28].mxu1 %vm112_vm0, %v1681_v25 }
 0x155   :  { %1013 = vmatprep.mubr.f32.mxu0 %v1478_v1  ;;  %1102 = vmatprep.mubr.f32.mxu1 %v1478_v1  ;;  %v319_v1 = vsub.s32 3, %v1768_v57 }
 0x157   :  { %v320_v3 = vrot.slane %v301_v59, %v319_v1 }
 0x158   :  { %1219 = vmatmul.mubr.msk.f32.gmra.mrb[30].mxu0 %vm112_vm0, %v1690_v16  ;;  %1223 = vmatmul.mubr.msk.f32.gmra.mrb[30].mxu1 %vm112_vm0, %v1690_v16 }
 0x1ea   :  { %v463_v4 = vpop.f32.mrb[0].mxu0  ;;  %v552_v6 = vpop.f32.mrb[0].mxu1 }
 0x1eb   :  { %v464_v8 = vadd.f32 %v463_v4, %v308_v61  ;;  %v553_v9 = vadd.f32 %v552_v6, %v316_v62  ;;  %v465_v12 = vpop.f32.mrb[1].mxu0  ;;  %v554_v25 = vpop.f32.mrb[1].mxu1 }
 0x1ec   :  { %v466_v13 = vadd.f32 %v465_v12, %v312_v63  ;;  %v555_v26 = vadd.f32 %v554_v25, %v320_v3  ;;  %v1800_v25 = vld [vmem:[%s1846_s5 + $0x8] sm:$0xff]  ;;  %s1479_s5 = smov [#allocation11]  }
 0x1ed   :  { %1109 = vst [vmem:[#allocation11] sm:$0xff] %v464_v8  ;;  %1111 = vst [vmem:[#allocation11 + $0x10] sm:$0xff] %v553_v9  ;;  %s1178_s12 = sshll.u32 %s1479_s5, 4  ;;  %s1179_s12 = int_to_ptr.vmem [resolvable:$true] %s1178_s12 }
 0x1ee   :  { %1110 = vst [vmem:[#allocation11 + $0x8] sm:$0xff] %v466_v13  ;;  %1112 = vst [vmem:[#allocation11 + $0x18] sm:$0xff] %v555_v26  ;;  %v469_v32 = vpop.f32.mrb[2].mxu0  ;;  %v558_v14 = vpop.f32.mrb[2].mxu1  ;;  %s1440_s13 = scalar_lea.vmem %s1179_s12, 8192  ;;  %p1445_p13 = scmp.lt.s32.totalorder %s1179_s12, %s1179_s12 }
 0x1ef   :  { %v470_v15 = vadd.f32 %v469_v32, %v308_v61  ;;  %v559_v16 = vadd.f32 %v558_v14, %v316_v62  ;;  %v471_v17 = vpop.f32.mrb[3].mxu0  ;;  %v560_v19 = vpop.f32.mrb[3].mxu1  ;;  %p1441_p12 = scmp.ne.s32.totalorder %s1179_s12, %s1440_s13  ;;  %p1446_p0 = scmp.lt.s32.totalorder %s1440_s13, %s1440_s13 }
 0x1f0   :  { %v472_v21 = vadd.f32 %v471_v17, %v312_v63  ;;  %v561_v22 = vadd.f32 %v560_v19, %v320_v3  ;;  %v340_v17 = vrot.slane %v1800_v25, %v307_v18  ;;  %v348_v19 = vrot.slane %v1800_v25, %v315_v58 }
 0x1f1   :  { %1125 = vst [vmem:[#allocation11 + $0x80] sm:$0xff] %v470_v15  ;;  %1127 = vst [vmem:[#allocation11 + $0x90] sm:$0xff] %v559_v16  ;;  %p1447_p1 = por %p1446_p0, %p1445_p13 }
 0x1f2   :  { %1126 = vst [vmem:[#allocation11 + $0x88] sm:$0xff] %v472_v21  ;;  %1128 = vst [vmem:[#allocation11 + $0x98] sm:$0xff] %v561_v22 }
 0x1f3   :  { %p1448_p2 = pnand %p1447_p1, %p1441_p12 }
 0x1f4   :  { %v475_v33 = vpop.f32.mrb[4].mxu0  ;;  %v564_v23 = vpop.f32.mrb[4].mxu1 }
 0x1f5   :  { %v476_v24 = vadd.f32 %v475_v33, %v308_v61  ;;  %v565_v27 = vadd.f32 %v564_v23, %v316_v62  ;;  %v477_v28 = vpop.f32.mrb[5].mxu0  ;;  %v566_v29 = vpop.f32.mrb[5].mxu1  ;;  %v344_v33 = vrot.slane %v1800_v25, %v311_v60  ;;  %v352_v23 = vrot.slane %v1800_v25, %v319_v1 }
 0x1f6   :  { %v478_v30 = vadd.f32 %v477_v28, %v312_v63  ;;  %v567_v2 = vadd.f32 %v566_v29, %v320_v3 }
 0x1f7   :  { %1141 = vst [vmem:[#allocation11 + $0x100] sm:$0xff] %v476_v24  ;;  %1143 = vst [vmem:[#allocation11 + $0x110] sm:$0xff] %v565_v27 }
 0x1f8   :  { %1142 = vst [vmem:[#allocation11 + $0x108] sm:$0xff] %v478_v30  ;;  %1144 = vst [vmem:[#allocation11 + $0x118] sm:$0xff] %v567_v2 }
 0x1fb   :  { %v481_v36 = vpop.f32.mrb[6].mxu0  ;;  %v570_v37 = vpop.f32.mrb[6].mxu1 }
 0x1fc   :  { %v482_v38 = vadd.f32 %v481_v36, %v308_v61  ;;  %v571_v39 = vadd.f32 %v570_v37, %v316_v62  ;;  %v483_v40 = vpop.f32.mrb[7].mxu0  ;;  %v572_v41 = vpop.f32.mrb[7].mxu1 }
 0x1fd   :  { %v484_v11 = vadd.f32 %v483_v40, %v312_v63  ;;  %v573_v43 = vadd.f32 %v572_v41, %v320_v3 }
 0x1fe   :  { %1157 = vst [vmem:[#allocation11 + $0x180] sm:$0xff] %v482_v38  ;;  %1159 = vst [vmem:[#allocation11 + $0x190] sm:$0xff] %v571_v39 }
 0x1ff   :  { %1158 = vst [vmem:[#allocation11 + $0x188] sm:$0xff] %v484_v11  ;;  %1160 = vst [vmem:[#allocation11 + $0x198] sm:$0xff] %v573_v43  ;;  %v641_v46 = vpop.f32.mrb[8].mxu0  ;;  %v730_v47 = vpop.f32.mrb[8].mxu1 }
 0x200   :  { %v642_v48 = vadd.f32 %v641_v46, %v324_v5  ;;  %v731_v49 = vadd.f32 %v730_v47, %v332_v42  ;;  %v643_v50 = vpop.f32.mrb[9].mxu0  ;;  %v732_v51 = vpop.f32.mrb[9].mxu1 }
 0x201   :  { %v644_v52 = vadd.f32 %v643_v50, %v328_v0  ;;  %v733_v53 = vadd.f32 %v732_v51, %v336_v45 }
 0x202   :  { %1113 = vst [vmem:[#allocation11 + $0x20] sm:$0xff] %v642_v48  ;;  %1115 = vst [vmem:[#allocation11 + $0x30] sm:$0xff] %v731_v49 }
 0x203   :  { %1114 = vst [vmem:[#allocation11 + $0x28] sm:$0xff] %v644_v52  ;;  %1116 = vst [vmem:[#allocation11 + $0x38] sm:$0xff] %v733_v53  ;;  %v647_v54 = vpop.f32.mrb[10].mxu0  ;;  %v736_v55 = vpop.f32.mrb[10].mxu1 }
 0x204   :  { %v648_v56 = vadd.f32 %v647_v54, %v324_v5  ;;  %v737_v10 = vadd.f32 %v736_v55, %v332_v42  ;;  %v649_v20 = vpop.f32.mrb[11].mxu0  ;;  %v738_v44 = vpop.f32.mrb[11].mxu1  ;;  %v356_v54 = vrot.slane %v1800_v25, %v323_v31  ;;  %v364_v55 = vrot.slane %v1800_v25, %v331_v7 }
 0x205   :  { %v650_v59 = vadd.f32 %v649_v20, %v328_v0  ;;  %v739_v61 = vadd.f32 %v738_v44, %v336_v45  ;;  %v360_v20 = vrot.slane %v1800_v25, %v327_v34  ;;  %v368_v44 = vrot.slane %v1800_v25, %v335_v35 }
 0x206   :  { %1129 = vst [vmem:[#allocation11 + $0xa0] sm:$0xff] %v648_v56  ;;  %1131 = vst [vmem:[#allocation11 + $0xb0] sm:$0xff] %v737_v10 }
 0x207   :  { %1130 = vst [vmem:[#allocation11 + $0xa8] sm:$0xff] %v650_v59  ;;  %1132 = vst [vmem:[#allocation11 + $0xb8] sm:$0xff] %v739_v61  ;;  %v653_v62 = vpop.f32.mrb[12].mxu0  ;;  %v742_v63 = vpop.f32.mrb[12].mxu1 }
 0x208   :  { %v654_v3 = vadd.f32 %v653_v62, %v324_v5  ;;  %v743_v4 = vadd.f32 %v742_v63, %v332_v42  ;;  %v655_v6 = vpop.f32.mrb[13].mxu0  ;;  %v744_v8 = vpop.f32.mrb[13].mxu1 }
 0x209   :  { %v656_v9 = vadd.f32 %v655_v6, %v328_v0  ;;  %v745_v12 = vadd.f32 %v744_v8, %v336_v45 }
 0x20a   :  { %1145 = vst [vmem:[#allocation11 + $0x120] sm:$0xff] %v654_v3  ;;  %1147 = vst [vmem:[#allocation11 + $0x130] sm:$0xff] %v743_v4 }
 0x20b   :  { %1146 = vst [vmem:[#allocation11 + $0x128] sm:$0xff] %v656_v9  ;;  %1148 = vst [vmem:[#allocation11 + $0x138] sm:$0xff] %v745_v12  ;;  %v659_v13 = vpop.f32.mrb[14].mxu0  ;;  %v748_v26 = vpop.f32.mrb[14].mxu1 }
 0x20c   :  { %v660_v32 = vadd.f32 %v659_v13, %v324_v5  ;;  %v749_v14 = vadd.f32 %v748_v26, %v332_v42  ;;  %v661_v15 = vpop.f32.mrb[15].mxu0  ;;  %v750_v16 = vpop.f32.mrb[15].mxu1 }
 0x20d   :  { %v662_v21 = vadd.f32 %v661_v15, %v328_v0  ;;  %v751_v22 = vadd.f32 %v750_v16, %v336_v45 }
 0x20e   :  { %1161 = vst [vmem:[#allocation11 + $0x1a0] sm:$0xff] %v660_v32  ;;  %1163 = vst [vmem:[#allocation11 + $0x1b0] sm:$0xff] %v749_v14 }
 0x20f   :  { %1162 = vst [vmem:[#allocation11 + $0x1a8] sm:$0xff] %v662_v21  ;;  %1164 = vst [vmem:[#allocation11 + $0x1b8] sm:$0xff] %v751_v22  ;;  %v819_v24 = vpop.f32.mrb[16].mxu0  ;;  %v908_v18 = vpop.f32.mrb[16].mxu1 }
 0x210   :  { %v820_v27 = vadd.f32 %v819_v24, %v340_v17  ;;  %v909_v28 = vadd.f32 %v908_v18, %v348_v19  ;;  %v821_v29 = vpop.f32.mrb[17].mxu0  ;;  %v910_v58 = vpop.f32.mrb[17].mxu1 }
 0x211   :  { %v822_v30 = vadd.f32 %v821_v29, %v344_v33  ;;  %v911_v2 = vadd.f32 %v910_v58, %v352_v23 }
 0x212   :  { %1117 = vst [vmem:[#allocation11 + $0x40] sm:$0xff] %v820_v27  ;;  %1119 = vst [vmem:[#allocation11 + $0x50] sm:$0xff] %v909_v28 }
 0x213   :  { %1118 = vst [vmem:[#allocation11 + $0x48] sm:$0xff] %v822_v30  ;;  %1120 = vst [vmem:[#allocation11 + $0x58] sm:$0xff] %v911_v2  ;;  %v825_v60 = vpop.f32.mrb[18].mxu0  ;;  %v914_v36 = vpop.f32.mrb[18].mxu1 }
 0x214   :  { %v826_v37 = vadd.f32 %v825_v60, %v340_v17  ;;  %v915_v1 = vadd.f32 %v914_v36, %v348_v19  ;;  %v827_v38 = vpop.f32.mrb[19].mxu0  ;;  %v916_v39 = vpop.f32.mrb[19].mxu1 }
 0x215   :  { %v828_v40 = vadd.f32 %v827_v38, %v344_v33  ;;  %v917_v41 = vadd.f32 %v916_v39, %v352_v23 }
 0x216   :  { %1133 = vst [vmem:[#allocation11 + $0xc0] sm:$0xff] %v826_v37  ;;  %1135 = vst [vmem:[#allocation11 + $0xd0] sm:$0xff] %v915_v1 }
 0x217   :  { %1134 = vst [vmem:[#allocation11 + $0xc8] sm:$0xff] %v828_v40  ;;  %1136 = vst [vmem:[#allocation11 + $0xd8] sm:$0xff] %v917_v41  ;;  %v831_v5 = vpop.f32.mrb[20].mxu0  ;;  %v920_v42 = vpop.f32.mrb[20].mxu1 }
 0x218   :  { %v832_v11 = vadd.f32 %v831_v5, %v340_v17  ;;  %v921_v43 = vadd.f32 %v920_v42, %v348_v19  ;;  %v833_v0 = vpop.f32.mrb[21].mxu0  ;;  %v922_v45 = vpop.f32.mrb[21].mxu1 }
 0x219   :  { %v834_v46 = vadd.f32 %v833_v0, %v344_v33  ;;  %v923_v47 = vadd.f32 %v922_v45, %v352_v23 }
 0x21a   :  { %1149 = vst [vmem:[#allocation11 + $0x140] sm:$0xff] %v832_v11  ;;  %1151 = vst [vmem:[#allocation11 + $0x150] sm:$0xff] %v921_v43 }
 0x21b   :  { %1150 = vst [vmem:[#allocation11 + $0x148] sm:$0xff] %v834_v46  ;;  %1152 = vst [vmem:[#allocation11 + $0x158] sm:$0xff] %v923_v47  ;;  %v837_v48 = vpop.f32.mrb[22].mxu0  ;;  %v926_v49 = vpop.f32.mrb[22].mxu1 }
 0x21c   :  { %v838_v50 = vadd.f32 %v837_v48, %v340_v17  ;;  %v927_v51 = vadd.f32 %v926_v49, %v348_v19  ;;  %v839_v52 = vpop.f32.mrb[23].mxu0  ;;  %v928_v53 = vpop.f32.mrb[23].mxu1 }
 0x21d   :  { %v840_v56 = vadd.f32 %v839_v52, %v344_v33  ;;  %v929_v10 = vadd.f32 %v928_v53, %v352_v23 }
 0x21e   :  { %1165 = vst [vmem:[#allocation11 + $0x1c0] sm:$0xff] %v838_v50  ;;  %1167 = vst [vmem:[#allocation11 + $0x1d0] sm:$0xff] %v927_v51 }
 0x21f   :  { %1166 = vst [vmem:[#allocation11 + $0x1c8] sm:$0xff] %v840_v56  ;;  %1168 = vst [vmem:[#allocation11 + $0x1d8] sm:$0xff] %v929_v10  ;;  %v997_v59 = vpop.f32.mrb[24].mxu0  ;;  %v1086_v31 = vpop.f32.mrb[24].mxu1 }
 0x220   :  { %v998_v61 = vadd.f32 %v997_v59, %v356_v54  ;;  %v1087_v62 = vadd.f32 %v1086_v31, %v364_v55  ;;  %v999_v63 = vpop.f32.mrb[25].mxu0  ;;  %v1088_v7 = vpop.f32.mrb[25].mxu1 }
 0x221   :  { %v1000_v3 = vadd.f32 %v999_v63, %v360_v20  ;;  %v1089_v4 = vadd.f32 %v1088_v7, %v368_v44 }
 0x222   :  { %1121 = vst [vmem:[#allocation11 + $0x60] sm:$0xff] %v998_v61  ;;  %1123 = vst [vmem:[#allocation11 + $0x70] sm:$0xff] %v1087_v62 }
 0x223   :  { %1122 = vst [vmem:[#allocation11 + $0x68] sm:$0xff] %v1000_v3  ;;  %1124 = vst [vmem:[#allocation11 + $0x78] sm:$0xff] %v1089_v4  ;;  %v1003_v34 = vpop.f32.mrb[26].mxu0  ;;  %v1092_v57 = vpop.f32.mrb[26].mxu1 }
 0x224   :  { %v1004_v6 = vadd.f32 %v1003_v34, %v356_v54  ;;  %v1093_v35 = vadd.f32 %v1092_v57, %v364_v55  ;;  %v1005_v8 = vpop.f32.mrb[27].mxu0  ;;  %v1094_v9 = vpop.f32.mrb[27].mxu1 }
 0x225   :  { %v1006_v12 = vadd.f32 %v1005_v8, %v360_v20  ;;  %v1095_v25 = vadd.f32 %v1094_v9, %v368_v44 }
 0x226   :  { %1137 = vst [vmem:[#allocation11 + $0xe0] sm:$0xff] %v1004_v6  ;;  %1139 = vst [vmem:[#allocation11 + $0xf0] sm:$0xff] %v1093_v35 }
 0x227   :  { %1138 = vst [vmem:[#allocation11 + $0xe8] sm:$0xff] %v1006_v12  ;;  %1140 = vst [vmem:[#allocation11 + $0xf8] sm:$0xff] %v1095_v25  ;;  %v1009_v13 = vpop.f32.mrb[28].mxu0  ;;  %v1098_v26 = vpop.f32.mrb[28].mxu1 }
 0x228   :  { %v1010_v32 = vadd.f32 %v1009_v13, %v356_v54  ;;  %v1099_v14 = vadd.f32 %v1098_v26, %v364_v55  ;;  %v1011_v15 = vpop.f32.mrb[29].mxu0  ;;  %v1100_v16 = vpop.f32.mrb[29].mxu1 }
 0x229   :  { %v1012_v17 = vadd.f32 %v1011_v15, %v360_v20  ;;  %v1101_v19 = vadd.f32 %v1100_v16, %v368_v44 }
 0x22a   :  { %1153 = vst [vmem:[#allocation11 + $0x160] sm:$0xff] %v1010_v32  ;;  %1155 = vst [vmem:[#allocation11 + $0x170] sm:$0xff] %v1099_v14 }
 0x22b   :  { %1154 = vst [vmem:[#allocation11 + $0x168] sm:$0xff] %v1012_v17  ;;  %1156 = vst [vmem:[#allocation11 + $0x178] sm:$0xff] %v1101_v19  ;;  %v1015_v21 = vpop.f32.mrb[30].mxu0  ;;  %v1104_v22 = vpop.f32.mrb[30].mxu1 }
 0x22c   :  { %v1016_v33 = vadd.f32 %v1015_v21, %v356_v54  ;;  %v1105_v23 = vadd.f32 %v1104_v22, %v364_v55  ;;  %v1017_v24 = vpop.f32.mrb[31].mxu0  ;;  %v1106_v18 = vpop.f32.mrb[31].mxu1 }
 0x22d   :  { %v1018_v27 = vadd.f32 %v1017_v24, %v360_v20  ;;  %v1107_v28 = vadd.f32 %v1106_v18, %v368_v44 }
 0x22e   :  { %1169 = vst [vmem:[#allocation11 + $0x1e0] sm:$0xff] %v1016_v33  ;;  %1171 = vst [vmem:[#allocation11 + $0x1f0] sm:$0xff] %v1105_v23 }
 0x22f   :  { %1170 = vst [vmem:[#allocation11 + $0x1e8] sm:$0xff] %v1018_v27  ;;  %1172 = vst [vmem:[#allocation11 + $0x1f8] sm:$0xff] %v1107_v28 }
 0x230   :  { %1451 = shalt.err (!%p1448_p2)
}
 0x231   :  { %s1452_s16 = scalar_lea.hbm %s1847_s6, 8192 }
 0x232   :  { %p1453_p3 = scmp.ne.s32.totalorder %s1847_s6, %s1452_s16  ;;  %p1456_p4 = scmp.lt.u32.totalorder %s1452_s16, %s1847_s6 }
 0x234   :  { %p1458_p5 = pnand %p1456_p4, %p1453_p3 }
 0x236   :  { %1461 = shalt.err (!%p1458_p5)
}
 0x237   :  { %1184 = dma.vmem_to_hbm [thread:$0]  %s1179_s12, 8192, %s1847_s6, [#allocation4], %s1477_s2, %s1477_s2, %s1472_s9  }
 0x238   :  { %1468 = dma.done.wait [#allocation4], 8192  }
 0x239   :  { %1469 = vsyncadd [#allocation4], 4294959104 }
 0x23a   :  { %1188 = vsyncpa [#allocation3], 1 }
 0x23b   :  { %1189 = vsyncpa [#allocation6], 1 }
 0x23c   :  { %1190 = vsyncpa [#allocation9], 1 }
 0x23d   :  { %1191 = vsyncpa [#allocation4], 1 }

</bundles_post_ra>
